<compile_context>
chip_gen: v7x
topology: tpu7x:2x2x1
jax: 0.10.0
libtpu: 0.0.40
codegen_flags: <defaults>
</compile_context>

<pallas_src>
import math
import functools

import jax
import jax.numpy as jnp
from jax.experimental import pallas as pl
from jax.experimental.pallas import tpu as pltpu


def _embed_pe_kernel(ids_ref, pos_ref, emb_ref, pe_ref, out_ref):
    """One grid step == one tile of M_TILE flattened (batch*seq) rows.

    ids_ref : (M_TILE, 1) int32   token ids for this row tile
    pos_ref : (M_TILE, 1) int32   sequence position (row % S) for this row tile
    emb_ref : (V, D)      float32 full embedding table (resident in VMEM)
    pe_ref  : (L, D)      float32 full positional-encoding table (resident)
    out_ref : (M_TILE, D) float32
    """
    m = ids_ref.shape[0]
    V = emb_ref.shape[0]
    L = pe_ref.shape[0]

    ids = ids_ref[...]                                         # (M, 1) int32
    pos = pos_ref[...]                                         # (M, 1) int32

    # Token gather as one-hot @ table on the MXU.
    iota_v = jax.lax.broadcasted_iota(jnp.int32, (m, V), 1)
    one_hot_tok = (ids == iota_v).astype(jnp.float32)          # (M, V)
    embedded = jnp.dot(one_hot_tok, emb_ref[...],
                       preferred_element_type=jnp.float32)     # (M, D)

    # Positional-encoding gather (pos < S <= L) with the same trick; this
    # matmul is tiny compared to the token gather and fuses the PE add.
    iota_l = jax.lax.broadcasted_iota(jnp.int32, (m, L), 1)
    one_hot_pos = (pos == iota_l).astype(jnp.float32)          # (M, L)
    pe_rows = jnp.dot(one_hot_pos, pe_ref[...],
                      preferred_element_type=jnp.float32)      # (M, D)

    out_ref[...] = (embedded + pe_rows).astype(out_ref.dtype)


def make_positional_encoding(max_seq_length: int, embedding_dim: int) -> jnp.ndarray:
    """Matches PositionalEncoding._create_positional_encoding (shape (L, D)).

    Assumes even embedding_dim (same as the PyTorch reference)."""
    positions = jnp.arange(max_seq_length, dtype=jnp.float32)[:, None]          # (L, 1)
    div_term = jnp.exp(jnp.arange(0, embedding_dim, 2, dtype=jnp.float32)
                       * (-math.log(10000.0) / embedding_dim))                  # (D/2,)
    pe = jnp.zeros((max_seq_length, embedding_dim), dtype=jnp.float32)
    pe = pe.at[:, 0::2].set(jnp.sin(positions * div_term))
    pe = pe.at[:, 1::2].set(jnp.cos(positions * div_term))
    return pe


def _round_up(x: int, m: int) -> int:
    return (x + m - 1) // m * m


@jax.jit
def ingredient_embedding_with_pe(ids, embedding_table, pos_encoding):
    """ids: (B, S) int; embedding_table: (V, D) f32; pos_encoding: (L, D) f32."""
    B, S = ids.shape
    V, D = embedding_table.shape
    L, _ = pos_encoding.shape

    # Flatten (B, S) -> N rows and tile the row axis.
    N = B * S
    m_tile = min(256, _round_up(N, 8))          # MXU-aligned row tile
    n_pad = _round_up(N, m_tile)

    ids_flat = ids.astype(jnp.int32).reshape(N, 1)
    pos_flat = (jnp.arange(N, dtype=jnp.int32) % S).reshape(N, 1)
    if n_pad != N:
        ids_flat = jnp.pad(ids_flat, ((0, n_pad - N), (0, 0)))
        pos_flat = jnp.pad(pos_flat, ((0, n_pad - N), (0, 0)))

    # Explicit VMEM budget: resident table + PE (single copy each, un-pipelined)
    # plus double-buffered id/pos/out row tiles.
    resident = V * D * 4 + L * D * 4
    per_step = 2 * (m_tile * 4) + 2 * (m_tile * 4) + 2 * (m_tile * D * 4)
    vmem_limit = int(min(max(2 * (resident + per_step) + (1 << 20), 4 << 20),
                         60 << 20))

    out_flat = pl.pallas_call(
        _embed_pe_kernel,
        out_shape=jax.ShapeDtypeStruct((n_pad, D), jnp.float32),
        grid_spec=pltpu.PrefetchScalarGridSpec(
            num_scalar_prefetch=0,
            grid=(n_pad // m_tile,),
            in_specs=[
                pl.BlockSpec((m_tile, 1), lambda i: (i, 0)),          # ids tile
                pl.BlockSpec((m_tile, 1), lambda i: (i, 0)),          # pos tile
                pl.BlockSpec(memory_space=pltpu.MemorySpace.VMEM),    # emb table (full, single copy)
                pl.BlockSpec(memory_space=pltpu.MemorySpace.VMEM),    # pos-encoding table (full)
            ],
            out_specs=pl.BlockSpec((m_tile, D), lambda i: (i, 0)),
        ),
        compiler_params=pltpu.CompilerParams(
            dimension_semantics=("parallel",),
            vmem_limit_bytes=vmem_limit),
    )(ids_flat, pos_flat, embedding_table, pos_encoding)

    return out_flat[:N].reshape(B, S, D)


if __name__ == "__main__":
    # Small, deterministic setup.
    vocab_size = 64
    embedding_dim = 128
    max_seq_length = 16
    batch_size = 2
    seq_length = 8

    key = jax.random.PRNGKey(0)
    k_emb, k_ids = jax.random.split(key)

    # nn.Embedding default init: N(0, 1)
    embedding_table = jax.random.normal(
        k_emb, (vocab_size, embedding_dim), dtype=jnp.float32)
    pos_encoding = make_positional_encoding(max_seq_length, embedding_dim)

    ids = jax.random.randint(
        k_ids, (batch_size, seq_length), 0, vocab_size, dtype=jnp.int32)

    out = ingredient_embedding_with_pe(ids, embedding_table, pos_encoding)
    out = jax.block_until_ready(out)

    # Pure-JAX reference (embedding gather + PE add, dropout in eval mode).
    ref = embedding_table[ids] + pos_encoding[None, :seq_length, :]
    assert out.shape == (batch_size, seq_length, embedding_dim)
    assert jnp.allclose(out, ref, atol=1e-5, rtol=1e-5)

    print("KERNEL_OK")
</pallas_src>

<mosaic_0001>
module attributes {stable_mosaic.version = 11 : i64} {
  func.func @_embed_pe_kernel(%arg0: i32, %arg1: memref<16x1xi32, #tpu.memory_space<vmem>>, %arg2: memref<16x1xi32, #tpu.memory_space<vmem>>, %arg3: memref<64x128xf32, #tpu.memory_space<vmem>>, %arg4: memref<16x128xf32, #tpu.memory_space<vmem>>, %arg5: memref<16x128xf32, #tpu.memory_space<vmem>>) attributes {dimension_semantics = [#tpu.dimension_semantics<parallel>], iteration_bounds = array<i64: 1>, scalar_prefetch = 0 : i64, scratch_operands = 0 : i64, tpu.core_type = #tpu.core_type<tc>, window_params = [{transform_indices = @transform_0, window_bounds = array<i64: 16, 1>}, {transform_indices = @transform_1, window_bounds = array<i64: 16, 1>}, {pipeline_mode = #tpu.pipeline_mode<synchronous>, transform_indices = @transform_2, window_bounds = array<i64: 64, 128>}, {pipeline_mode = #tpu.pipeline_mode<synchronous>, transform_indices = @transform_3, window_bounds = array<i64: 16, 128>}, {transform_indices = @transform_4, window_bounds = array<i64: 16, 128>}]} {
    %c0 = arith.constant 0 : index
    %c0_0 = arith.constant 0 : index
    %0 = vector.load %arg1[%c0, %c0_0] : memref<16x1xi32, #tpu.memory_space<vmem>>, vector<16x1xi32>
    %c0_1 = arith.constant 0 : index
    %c0_2 = arith.constant 0 : index
    %1 = vector.load %arg2[%c0_1, %c0_2] : memref<16x1xi32, #tpu.memory_space<vmem>>, vector<16x1xi32>
    %2 = tpu.iota {dimensions = array<i32: 1>} : vector<16x64xi32>
    %3 = vector.broadcast %0 : vector<16x1xi32> to vector<16x64xi32>
    %4 = arith.cmpi eq, %3, %2 : vector<16x64xi32>
    %5 = arith.extui %4 : vector<16x64xi1> to vector<16x64xi32>
    %6 = arith.sitofp %5 : vector<16x64xi32> to vector<16x64xf32>
    %c0_3 = arith.constant 0 : index
    %c0_4 = arith.constant 0 : index
    %7 = vector.load %arg3[%c0_3, %c0_4] : memref<64x128xf32, #tpu.memory_space<vmem>>, vector<64x128xf32>
    %cst = arith.constant dense<0.000000e+00> : vector<16x128xf32>
    %8 = tpu.matmul %6, %7, %cst {dimension_numbers = #tpu.dot_dimension_numbers<[1], [0], [0], [1], [0, 0, 1, 1], [], []>} : vector<16x64xf32>, vector<64x128xf32>, vector<16x128xf32> -> vector<16x128xf32>
    %9 = tpu.iota {dimensions = array<i32: 1>} : vector<16x16xi32>
    %10 = vector.broadcast %1 : vector<16x1xi32> to vector<16x16xi32>
    %11 = arith.cmpi eq, %10, %9 : vector<16x16xi32>
    %12 = arith.extui %11 : vector<16x16xi1> to vector<16x16xi32>
    %13 = arith.sitofp %12 : vector<16x16xi32> to vector<16x16xf32>
    %c0_5 = arith.constant 0 : index
    %c0_6 = arith.constant 0 : index
    %14 = vector.load %arg4[%c0_5, %c0_6] : memref<16x128xf32, #tpu.memory_space<vmem>>, vector<16x128xf32>
    %cst_7 = arith.constant dense<0.000000e+00> : vector<16x128xf32>
    %15 = tpu.matmul %13, %14, %cst_7 {dimension_numbers = #tpu.dot_dimension_numbers<[1], [0], [0], [1], [0, 0, 1, 1], [], []>} : vector<16x16xf32>, vector<16x128xf32>, vector<16x128xf32> -> vector<16x128xf32>
    %16 = arith.addf %8, %15 : vector<16x128xf32>
    %c0_8 = arith.constant 0 : index
    %c0_9 = arith.constant 0 : index
    %17 = vector.load %arg5[%c0_8, %c0_9] : memref<16x128xf32, #tpu.memory_space<vmem>>, vector<16x128xf32>
    tpu.vector_store %arg5[%c0_8, %c0_9], %16 {strides = array<i32>} : memref<16x128xf32, #tpu.memory_space<vmem>>, vector<16x128xf32>,
    return
  }
  func.func @transform_0(%arg0: i32) -> (i32, i32) {
    %c0_i32 = arith.constant 0 : i32
    %c0_i32_0 = arith.constant 0 : i32
    return %arg0, %c0_i32 : i32, i32
  }
  func.func @transform_1(%arg0: i32) -> (i32, i32) {
    %c0_i32 = arith.constant 0 : i32
    %c0_i32_0 = arith.constant 0 : i32
    return %arg0, %c0_i32 : i32, i32
  }
  func.func @transform_2(%arg0: i32) -> (i32, i32) {
    %c0_i32 = arith.constant 0 : i32
    %c0_i32_0 = arith.constant 0 : i32
    %c0_i32_1 = arith.constant 0 : i32
    return %c0_i32, %c0_i32_0 : i32, i32
  }
  func.func @transform_3(%arg0: i32) -> (i32, i32) {
    %c0_i32 = arith.constant 0 : i32
    %c0_i32_0 = arith.constant 0 : i32
    %c0_i32_1 = arith.constant 0 : i32
    return %c0_i32, %c0_i32_0 : i32, i32
  }
  func.func @transform_4(%arg0: i32) -> (i32, i32) {
    %c0_i32 = arith.constant 0 : i32
    %c0_i32_0 = arith.constant 0 : i32
    return %arg0, %c0_i32 : i32, i32
  }
}

</mosaic_0001>

<bundles_post_ra>
// kernel: ingredient_embedding_with_pe.1
= control target key start
LH: loop header
LB: loop body
LE: loop exit
PB: predicated region body
PF: predicated region fallthrough
CT: control target
= control target key end

     0   :  { %9 = vsyncpa [#allocation3], 0  ;;  %s460_s0 = inlined_call_operand.vmem [shape: s32[16,1], index: 0, kind: input, shape index: {}]   ;;  %s461_s1 = inlined_call_operand.vmem [shape: s32[16,1], index: 1, kind: input, shape index: {}]   ;;  %s462_s2 = inlined_call_operand.hbm [shape: f32[64,128], index: 2, kind: input, shape index: {}]   ;;  %s463_s3 = inlined_call_operand.vmem [shape: f32[16,128], index: 3, kind: input, shape index: {}]   ;;  %s464_s4 = inlined_call_operand.hbm [shape: f32[16,128], index: 4, kind: output, shape index: {}]  }
   0x1   :  { %10 = vsyncpa [#allocation4], 0  ;;  %s381_s15 = smov [#allocation2]   ;;  %s333_s19 = scalar_lea.hbm %s462_s2, 1024 }
   0x2   :  { %s20_s16 = sshll.u32 %s381_s15, 4  ;;  %p334_p0 = scmp.ne.s32.totalorder %s462_s2, %s333_s19  ;;  %s21_s16 = int_to_ptr.vmem [resolvable:$true] %s20_s16 }
   0x3   :  { %p337_p1 = scmp.lt.u32.totalorder %s333_s19, %s462_s2 }
   0x5   :  { %p339_p2 = pnand %p337_p1, %p334_p0 }
   0x7   :  { %342 = shalt.err (!%p339_p2)
}
   0x8   :  { %s343_s24 = scalar_lea.vmem %s21_s16, 1024  ;;  %p348_p4 = scmp.lt.s32.totalorder %s21_s16, %s21_s16 }
   0x9   :  { %p344_p3 = scmp.ne.s32.totalorder %s21_s16, %s343_s24  ;;  %p349_p5 = scmp.lt.s32.totalorder %s343_s24, %s343_s24 }
   0xb   :  { %p350_p6 = por %p349_p5, %p348_p4 }
   0xd   :  { %p351_p7 = pnand %p350_p6, %p344_p3 }
   0xf   :  { %354 = shalt.err (!%p351_p7)
}
  0x10   :  { %s382_s25 = smov 128   ;;  %s383_s26 = smov 8  }
  0x11   :  { %26 = dma.hbm_to_vmem [thread:$0]  %s462_s2, 1024, %s21_s16, [#allocation3], %s382_s25, %s382_s25, %s383_s26  }
  0x12   :  { %377 = dma.done.wait [#allocation3], 1024  }
  0x13   :  { %378 = vsyncadd [#allocation3], 4294966272  ;;  %v384_v0 = vmov 0   ;;  %v33_v1 = vld [vmem:[%s460_s0 + $0x8] sm:$0xff]  ;;  %v32_v2 = vld [vmem:[%s460_s0] sm:$0xff]  ;;  %v36_v20 = vlaneseq  ;;  %vm154_vm0 = vcmask 523264  }
  0x14   :  { %332 = vset.pattern.permute.xlu1 %v384_v0  ;;  %331 = vset.pattern.permute.xlu0 %v384_v0  ;;  %v35_v3 = vld [vmem:[%s461_s1 + $0x8] sm:$0xff]  ;;  %v50_v4 = vld [vmem:[#allocation2] sm:$0xff]  ;;  %v52_v8 = vld [vmem:[#allocation2 + $0x10] sm:$0xff]  ;;  %v385_v24 = vmov 0.0   ;;  %vm72_vm3 = vcmask 130048  }
  0x15   :  { %42 = vperm.xlu1 %332, %v33_v1   ;;  %39 = vperm.xlu0 %331, %v32_v2   ;;  %v51_v5 = vld [vmem:[#allocation2 + $0x8] sm:$0xff]  ;;  %v34_v6 = vld [vmem:[%s461_s1] sm:$0xff]  ;;  %v53_v9 = vld [vmem:[#allocation2 + $0x18] sm:$0xff]  ;;  %v37_v21 = vand.u32 127, %v36_v20  ;;  %s386_s1 = smov [#allocation5]  }
  0x16   :  { %v307_v7 = vpack.c.bf16 %v51_v5, %v50_v4  ;;  %v311_v10 = vpack.c.bf16 %v53_v9, %v52_v8  ;;  %v54_v11 = vld [vmem:[#allocation2 + $0x20] sm:$0xff]  ;;  %v55_v12 = vld [vmem:[#allocation2 + $0x28] sm:$0xff]  ;;  %v56_v17 = vld [vmem:[#allocation2 + $0x30] sm:$0xff] }
  0x17   :  { %v70_v13 = vld [vmem:[%s463_s3] sm:$0xff]  ;;  %v71_v14 = vld [vmem:[%s463_s3 + $0x8] sm:$0xff]  ;;  %v315_v16 = vpack.c.bf16 %v55_v12, %v54_v11  ;;  %v57_v18 = vld [vmem:[#allocation2 + $0x38] sm:$0xff]  ;;  %s243_s3 = sshll.u32 %s386_s1, 4  ;;  %s244_s3 = int_to_ptr.vmem [resolvable:$true] %s243_s3 }
  0x18   :  { %308 = vmatprep.subr.bf16.mxu0 %v307_v7  ;;  %v303_v15 = vpack.c.bf16 %v71_v14, %v70_v13  ;;  %v319_v19 = vpack.c.bf16 %v57_v18, %v56_v17  ;;  %s355_s13 = scalar_lea.vmem %s244_s3, 256  ;;  %p360_p9 = scmp.lt.s32.totalorder %s244_s3, %s244_s3 }
  0x19   :  { %62 = vperm.xlu1 %332, %v35_v3   ;;  %59 = vperm.xlu0 %331, %v34_v6   ;;  %p356_p8 = scmp.ne.s32.totalorder %s244_s3, %s355_s13  ;;  %p361_p10 = scmp.lt.s32.totalorder %s355_s13, %s355_s13 }
  0x1a   :  { %310 = vmatpush3.bf16.msra.mxu0 %v307_v7  ;;  %304 = vmatprep.subr.bf16.mxu1 %v303_v15 }
  0x1b   :  { %312 = vmatprep.subr.bf16.mxu0 %v311_v10  ;;  %306 = vmatpush3.bf16.msra.mxu1 %v303_v15  ;;  %p362_p11 = por %p361_p10, %p360_p9 }
  0x1d   :  { %p363_p12 = pnand %p362_p11, %p356_p8 }
  0x1e   :  { %314 = vmatpush3.bf16.msra.mxu0 %v311_v10 }
  0x1f   :  { %316 = vmatprep.subr.bf16.mxu0 %v315_v16 }
  0x22   :  { %318 = vmatpush3.bf16.msra.mxu0 %v315_v16 }
  0x23   :  { %320 = vmatprep.subr.bf16.mxu0 %v319_v19 }
  0x26   :  { %322 = vmatpush3.bf16.msra.mxu0 %v319_v19 }
  0x94   :  { %v43_v22 = vpop.permute.xlu1 %42  ;;  %v40_v23 = vpop.permute.xlu0 %39 }
  0x95   :  { %vm45_vm1 = vcmp.eq.s32.totalorder %v43_v22, %v37_v21  ;;  %vm44_vm2 = vcmp.eq.s32.totalorder %v40_v23, %v37_v21 }
  0x96   :  { %v256_v25 = vsel %vm45_vm1, 1.0, %v385_v24  ;;  %v255_v26 = vsel %vm44_vm2, 1.0, %v385_v24 }
  0x97   :  { %300 = vmatprep.mubr.msk.f32.mxu0 %vm154_vm0, %v255_v26 }
  0x98   :  { %v63_v27 = vpop.permute.xlu1 %62  ;;  %301 = vmatmul.mubr.msk.f32.vlgmr.msra.gmra.mrb[0].mxu0 %vm154_vm0, %v256_v25  ;;  %v60_v28 = vpop.permute.xlu0 %59 }
  0x99   :  { %vm65_vm4 = vcmp.eq.s32.totalorder %v63_v27, %v37_v21  ;;  %vm64_vm5 = vcmp.eq.s32.totalorder %v60_v28, %v37_v21 }
  0x9a   :  { %v258_v29 = vsel %vm65_vm4, 1.0, %v385_v24  ;;  %v257_v30 = vsel %vm64_vm5, 1.0, %v385_v24 }
  0x9b   :  { %281 = vmatprep.mubr.msk.f32.mxu1 %vm72_vm3, %v257_v30 }
  0x9c   :  { %282 = vmatmul.mubr.msk.f32.vlgmr.msra.gmra.mrb[0].mxu1 %vm72_vm3, %v258_v29 }
 0x16b   :  { %v302_v31 = vpop.f32.mrb[0].mxu0 }
 0x16c   :  { %v227_v32 = vpop.f32.mrb[1].mxu0 }
 0x16f   :  { %v283_v33 = vpop.f32.mrb[0].mxu1 }
 0x170   :  { %v233_v34 = vadd.f32 %v302_v31, %v283_v33  ;;  %v145_v35 = vpop.f32.mrb[1].mxu1 }
 0x171   :  { %v228_v36 = vadd.f32 %v227_v32, %v145_v35 }
 0x172   :  { %237 = vst [vmem:[#allocation5 + $0x8] sm:$0xff] %v233_v34 }
 0x173   :  { %236 = vst [vmem:[#allocation5] sm:$0xff] %v228_v36 }
 0x174   :  { %366 = shalt.err (!%p363_p12)
}
 0x175   :  { %s367_s16 = scalar_lea.hbm %s464_s4, 256 }
 0x176   :  { %p368_p13 = scmp.ne.s32.totalorder %s464_s4, %s367_s16  ;;  %p371_p0 = scmp.lt.u32.totalorder %s367_s16, %s464_s4 }
 0x178   :  { %p373_p1 = pnand %p371_p0, %p368_p13 }
 0x17a   :  { %376 = shalt.err (!%p373_p1)
}
 0x17b   :  { %249 = dma.vmem_to_hbm [thread:$0]  %s244_s3, 256, %s464_s4, [#allocation4], %s382_s25, %s382_s25, %s383_s26  }
 0x17c   :  { %379 = dma.done.wait [#allocation4], 256  }
 0x17d   :  { %380 = vsyncadd [#allocation4], 4294967040 }
 0x17e   :  { %253 = vsyncpa [#allocation3], 1 }
 0x17f   :  { %254 = vsyncpa [#allocation4], 1 }

</bundles_post_ra>
